<compile_context>
chip_gen: v6e
topology: v6e:2x2x1
jax: 0.10.0
libtpu: 0.0.40
codegen_flags: <defaults>
</compile_context>

<pallas_src>
import math

import jax
import jax.numpy as jnp
from jax.experimental import pallas as pl
from jax.experimental.pallas import tpu as pltpu


def _round_up(n: int, m: int) -> int:
    return ((n + m - 1) // m) * m


def _largest_divisor_tile(dim_p: int, align: int, max_tile: int) -> int:
    """Largest multiple of `align` that divides dim_p and is <= max_tile."""
    best = align
    t = align
    limit = min(dim_p, max_tile)
    while t <= limit:
        if dim_p % t == 0:
            best = t
        t += align
    return best


def _linear_kernel(x_ref, w_ref, b_ref, o_ref, acc_ref):
    # x_ref: (tm, tk) input dtype   w_ref: (tk, tn) compute dtype
    # b_ref: (1, tn) f32            o_ref: (tm, tn) out dtype
    # acc_ref: (tm, tn) f32 scratch, resident across the K axis.
    k = pl.program_id(2)

    @pl.when(k == 0)
    def _init():
        acc_ref[...] = jnp.zeros_like(acc_ref)

    acc_ref[...] += jnp.dot(
        x_ref[...].astype(w_ref.dtype),      # free VPU cast under MXU slack
        w_ref[...],
        preferred_element_type=jnp.float32,  # f32 accumulation on the MXU
    )

    @pl.when(k == pl.num_programs(2) - 1)
    def _store():
        o_ref[...] = (acc_ref[...] + b_ref[...]).astype(o_ref.dtype)


def prepare_params(weight, bias=None, *, compute_dtype=jnp.float32):
    """One-time weight prep: transpose + cast + lane-dense zero pad.

    weight: (out_features, in_features)  (PyTorch layout)
    bias:   (out_features,) or None
    """
    OUT, IN = weight.shape
    align_n = 256 if OUT >= 256 else 128       # 2x256x256 MXU on v6e/v7x
    IN_p = _round_up(IN, 128)
    OUT_p = _round_up(OUT, align_n)

    w = weight.T.astype(compute_dtype)         # (IN, OUT)
    if (IN_p, OUT_p) != (IN, OUT):
        w = jnp.pad(w, ((0, IN_p - IN), (0, OUT_p - OUT)))  # zero pad => exact

    if bias is None:
        b = jnp.zeros((1, OUT_p), jnp.float32)
    else:
        b = bias.astype(jnp.float32).reshape(1, OUT)
        if OUT_p != OUT:
            b = jnp.pad(b, ((0, 0), (0, OUT_p - OUT)))

    return {"w": w, "b": b, "in_features": IN, "out_features": OUT}


_TK_MAX = 1024                    # max K chunk per grid step
_TN_MAX = 512                     # max output-feature tile
_VMEM_BLOCK_BUDGET = 24 << 20     # double-buffered blocks + accumulator


def linear_mango_apply(x, prepared, *, out_dtype=None, tm=None):
    """y = x @ W^T + b with a prepared weight (see prepare_params)."""
    IN = prepared["in_features"]
    OUT = prepared["out_features"]
    w = prepared["w"]
    b = prepared["b"]
    IN_p, OUT_p = w.shape
    out_dtype = x.dtype if out_dtype is None else out_dtype

    orig_shape = x.shape
    assert orig_shape[-1] == IN, "weight / input feature mismatch"
    x2 = x.reshape(-1, IN)
    N = x2.shape[0]
    if IN_p != IN:
        # Zero K (lane) padding is REQUIRED: OOB garbage along K (possibly
        # NaN/Inf) would otherwise contaminate the accumulator of valid rows.
        x2 = jnp.pad(x2, ((0, 0), (0, IN_p - IN)))

    in_bytes = jnp.dtype(x.dtype).itemsize
    cd_bytes = jnp.dtype(w.dtype).itemsize
    out_bytes = jnp.dtype(out_dtype).itemsize

    # ---- tile plan ------------------------------------------------------
    align_n = 256 if (OUT_p >= 256 and OUT_p % 256 == 0) else 128
    tn = _largest_divisor_tile(OUT_p, align_n, _TN_MAX)   # exact divisor
    tk = _largest_divisor_tile(IN_p, 128, _TK_MAX)        # exact divisor (K!)

    if tm is None:
        w_total = IN_p * OUT_p * cd_bytes
        tm = 1024 if w_total <= (2 << 20) else (512 if w_total <= (16 << 20) else 256)
    tm = max(8, _round_up(min(tm, _round_up(N, 8)), 8))
    # Keep >=2 row tiles so v7x's second TensorCore gets work on medium batches.
    if pl.cdiv(N, tm) < 2 and N > 8:
        tm = _round_up(pl.cdiv(N, 2), 8)

    def _footprint(tm_):
        return (2 * (tm_ * tk * in_bytes      # x block, double buffered
                     + tk * tn * cd_bytes     # w block, double buffered
                     + tn * 4                 # bias block
                     + tm_ * tn * out_bytes)  # out block
                + tm_ * tn * 4)               # f32 accumulator scratch

    while _footprint(tm) > _VMEM_BLOCK_BUDGET and tm > 8:
        tm = max(8, _round_up(tm // 2, 8))

    grid = (pl.cdiv(N, tm), OUT_p // tn, IN_p // tk)

    cost = pl.CostEstimate(
        flops=2 * N * IN_p * OUT_p,
        transcendentals=0,
        bytes_accessed=(N * IN_p * in_bytes + IN_p * OUT_p * cd_bytes
                        + OUT_p * 4 + N * OUT_p * out_bytes),
    )
    vmem_limit = int(min(max(2 * _footprint(tm) + (4 << 20), 32 << 20), 60 << 20))

    out = pl.pallas_call(
        _linear_kernel,
        out_shape=jax.ShapeDtypeStruct((N, OUT_p), out_dtype),
        grid_spec=pltpu.PrefetchScalarGridSpec(
            num_scalar_prefetch=0,
            grid=grid,
            in_specs=[
                pl.BlockSpec((tm, tk), lambda i, j, k: (i, k)),   # x row tile
                pl.BlockSpec((tk, tn), lambda i, j, k: (k, j)),   # W^T tile
                pl.BlockSpec((1, tn), lambda i, j, k: (0, j)),    # bias tile
            ],
            out_specs=pl.BlockSpec((tm, tn), lambda i, j, k: (i, j)),
            scratch_shapes=[pltpu.VMEM((tm, tn), jnp.float32)],
        ),
        compiler_params=pltpu.CompilerParams(
            dimension_semantics=("parallel", "parallel", "arbitrary"),
            vmem_limit_bytes=vmem_limit,
        ),
        cost_estimate=cost,
    )(x2, w, b)

    if OUT_p != OUT:
        out = out[:, :OUT]
    return out.reshape(*orig_shape[:-1], OUT)


def linear_mango(x, weight, bias=None, *, compute_dtype=jnp.float32,
                 out_dtype=None, tm=None):
    """One-shot convenience wrapper (prepares the weight every call)."""
    prepared = prepare_params(weight, bias, compute_dtype=compute_dtype)
    return linear_mango_apply(x, prepared, out_dtype=out_dtype, tm=tm)


def init_params(key, in_features, out_features):
    """PyTorch init: kaiming_uniform_(a=sqrt(5)) + uniform bias, both reduce to
    U(-1/sqrt(fan_in), +1/sqrt(fan_in))."""
    kw, kb = jax.random.split(key)
    bound = 1.0 / math.sqrt(in_features)
    w = jax.random.uniform(kw, (out_features, in_features), jnp.float32, -bound, bound)
    b = jax.random.uniform(kb, (out_features,), jnp.float32, -bound, bound)
    return {"weight": w, "bias": b}


# TODO(synk): Linear_Mango.backward (inverse-weight solve) is not part of the
# forward pass and is not implemented here.


if __name__ == "__main__":
    key = jax.random.PRNGKey(0)
    k_p, k_x, k_x2 = jax.random.split(key, 3)

    in_features, out_features = 96, 30   # out=30 matches the docstring example
    params = init_params(k_p, in_features, out_features)

    # Prepare-once (hoists transpose / cast / pad out of the per-call path).
    prep_f32 = prepare_params(params["weight"], params["bias"],
                              compute_dtype=jnp.float32)
    prep_bf16 = prepare_params(params["weight"], params["bias"],
                               compute_dtype=jnp.bfloat16)

    # (N, *, H_in) input; leading dims are flattened inside the wrapper.
    x = jax.random.normal(k_x, (2, 8, in_features), dtype=jnp.float32)
    ref = x @ params["weight"].T + params["bias"]

    # Default f32 path: drop-in numerics for F.linear.
    out_f32 = jax.block_until_ready(linear_mango_apply(x, prep_f32))
    assert out_f32.shape == (2, 8, out_features)
    assert jnp.allclose(out_f32, ref, atol=1e-4, rtol=1e-4), "f32 path mismatch"

    # Explicit bf16 fast path (bf16 MXU operands, f32 accumulation).
    out_bf16 = jax.block_until_ready(linear_mango_apply(x, prep_bf16))
    assert jnp.allclose(out_bf16, ref, atol=3e-2, rtol=3e-2), "bf16 path mismatch"

    # Ragged row count exercises the masked partial row tile (no row-pad copy)
    # and the feature-dim lane padding.
    x_small = jax.random.normal(k_x2, (13, in_features), dtype=jnp.float32)
    ref_small = x_small @ params["weight"].T + params["bias"]
    out_small = jax.block_until_ready(
        linear_mango(x_small, params["weight"], params["bias"]))
    assert out_small.shape == (13, out_features)
    assert jnp.allclose(out_small, ref_small, atol=1e-4, rtol=1e-4), \
        "padded path mismatch"

    print("KERNEL_OK")
</pallas_src>

<mosaic_0001>
module attributes {stable_mosaic.version = 11 : i64} {
  func.func @_linear_kernel(%arg0: i32, %arg1: i32, %arg2: i32, %arg3: memref<8x128xf32, #tpu.memory_space<vmem>>, %arg4: memref<128x128xf32, #tpu.memory_space<vmem>>, %arg5: memref<1x128xf32, #tpu.memory_space<vmem>>, %arg6: memref<8x128xf32, #tpu.memory_space<vmem>>, %arg7: memref<8x128xf32, #tpu.memory_space<vmem>>) attributes {dimension_semantics = [#tpu.dimension_semantics<parallel>, #tpu.dimension_semantics<parallel>, #tpu.dimension_semantics<arbitrary>], iteration_bounds = array<i64: 2, 1, 1>, scalar_prefetch = 0 : i64, scratch_operands = 1 : i64, tpu.core_type = #tpu.core_type<tc>, window_params = [{transform_indices = @transform_0, window_bounds = array<i64: 8, 128>}, {transform_indices = @transform_1, window_bounds = array<i64: 128, 128>}, {transform_indices = @transform_2, window_bounds = array<i64: 1, 128>}, {transform_indices = @transform_3, window_bounds = array<i64: 8, 128>}]} {
    %c0_i32 = arith.constant 0 : i32
    %0 = arith.cmpi eq, %arg2, %c0_i32 : i32
    %1 = arith.extui %0 : i1 to i32
    %c0_i32_0 = arith.constant 0 : i32
    %2 = arith.cmpi ne, %1, %c0_i32_0 : i32
    scf.if %2 {
      %cst_10 = arith.constant 0.000000e+00 : f32
      %12 = vector.broadcast %cst_10 : f32 to vector<8x128xf32>
      %c0_11 = arith.constant 0 : index
      %c0_12 = arith.constant 0 : index
      %13 = vector.load %arg7[%c0_11, %c0_12] : memref<8x128xf32, #tpu.memory_space<vmem>>, vector<8x128xf32>
      tpu.vector_store %arg7[%c0_11, %c0_12], %12 {strides = array<i32>} : memref<8x128xf32, #tpu.memory_space<vmem>>, vector<8x128xf32>,
    } else {
    }
    %c0 = arith.constant 0 : index
    %c0_1 = arith.constant 0 : index
    %3 = vector.load %arg7[%c0, %c0_1] : memref<8x128xf32, #tpu.memory_space<vmem>>, vector<8x128xf32>
    %c0_2 = arith.constant 0 : index
    %c0_3 = arith.constant 0 : index
    %4 = vector.load %arg3[%c0_2, %c0_3] : memref<8x128xf32, #tpu.memory_space<vmem>>, vector<8x128xf32>
    %c0_4 = arith.constant 0 : index
    %c0_5 = arith.constant 0 : index
    %5 = vector.load %arg4[%c0_4, %c0_5] : memref<128x128xf32, #tpu.memory_space<vmem>>, vector<128x128xf32>
    %cst = arith.constant dense<0.000000e+00> : vector<8x128xf32>
    %6 = tpu.matmul %4, %5, %cst {dimension_numbers = #tpu.dot_dimension_numbers<[1], [0], [0], [1], [0, 0, 1, 1], [], []>} : vector<8x128xf32>, vector<128x128xf32>, vector<8x128xf32> -> vector<8x128xf32>
    %7 = arith.addf %3, %6 : vector<8x128xf32>
    %c0_6 = arith.constant 0 : index
    %c0_7 = arith.constant 0 : index
    %8 = vector.load %arg7[%c0_6, %c0_7] : memref<8x128xf32, #tpu.memory_space<vmem>>, vector<8x128xf32>
    tpu.vector_store %arg7[%c0_6, %c0_7], %7 {strides = array<i32>} : memref<8x128xf32, #tpu.memory_space<vmem>>, vector<8x128xf32>,
    %c0_i32_8 = arith.constant 0 : i32
    %9 = arith.cmpi eq, %arg2, %c0_i32_8 : i32
    %10 = arith.extui %9 : i1 to i32
    %c0_i32_9 = arith.constant 0 : i32
    %11 = arith.cmpi ne, %10, %c0_i32_9 : i32
    scf.if %11 {
      %c0_10 = arith.constant 0 : index
      %c0_11 = arith.constant 0 : index
      %12 = vector.load %arg7[%c0_10, %c0_11] : memref<8x128xf32, #tpu.memory_space<vmem>>, vector<8x128xf32>
      %c0_12 = arith.constant 0 : index
      %c0_13 = arith.constant 0 : index
      %13 = vector.load %arg5[%c0_12, %c0_13] : memref<1x128xf32, #tpu.memory_space<vmem>>, vector<1x128xf32>
      %14 = vector.broadcast %13 : vector<1x128xf32> to vector<8x128xf32>
      %15 = arith.addf %12, %14 : vector<8x128xf32>
      %c0_14 = arith.constant 0 : index
      %c0_15 = arith.constant 0 : index
      %16 = vector.load %arg6[%c0_14, %c0_15] : memref<8x128xf32, #tpu.memory_space<vmem>>, vector<8x128xf32>
      tpu.vector_store %arg6[%c0_14, %c0_15], %15 {strides = array<i32>} : memref<8x128xf32, #tpu.memory_space<vmem>>, vector<8x128xf32>,
    } else {
    }
    return
  }
  func.func @transform_0(%arg0: i32, %arg1: i32, %arg2: i32) -> (i32, i32) {
    %c0_i32 = arith.constant 0 : i32
    return %arg0, %arg2 : i32, i32
  }
  func.func @transform_1(%arg0: i32, %arg1: i32, %arg2: i32) -> (i32, i32) {
    %c0_i32 = arith.constant 0 : i32
    return %arg2, %arg1 : i32, i32
  }
  func.func @transform_2(%arg0: i32, %arg1: i32, %arg2: i32) -> (i32, i32) {
    %c0_i32 = arith.constant 0 : i32
    %c0_i32_0 = arith.constant 0 : i32
    return %c0_i32, %arg1 : i32, i32
  }
  func.func @transform_3(%arg0: i32, %arg1: i32, %arg2: i32) -> (i32, i32) {
    %c0_i32 = arith.constant 0 : i32
    return %arg0, %arg1 : i32, i32
  }
}

</mosaic_0001>

<bundles_post_ra>
// kernel: tpu_custom_call.1
= control target key start
LH: loop header
LB: loop body
LE: loop exit
PB: predicated region body
PF: predicated region fallthrough
CT: control target
= control target key end

     0   :  { %8 = vsyncpa [#allocation4], 0  ;;  %s979_s0 = inlined_call_operand.hbm [shape: f32[16,128], index: 0, kind: input, shape index: {}]   ;;  %s980_s1 = inlined_call_operand.hbm [shape: f32[128,128], index: 1, kind: input, shape index: {}]   ;;  %s981_s2 = inlined_call_operand.vmem [shape: f32[1,128], index: 2, kind: input, shape index: {}]   ;;  %s982_s3 = inlined_call_operand.hbm [shape: f32[16,128], index: 3, kind: output, shape index: {}]  }
   0x1   :  { %10 = vsyncpa [#allocation4 + $0x1], 0 }
   0x2   :  { %11 = vsyncpa [#allocation7], 0 }
   0x3   :  { %12 = vsyncpa [#allocation5], 0 }
   0x4   :  { %14 = vsyncpa [#allocation5 + $0x1], 0  ;;  %s796_s12 = smov 0   ;;  %s798_s13 = smov 0  }
   0x5   :  { %s800_s14 = smov 0   ;;  %s802_s15 = smov 0  }
   0x6   :  { %s804_s16 = smov 0   ;;  %s806_s17 = smov 0  }
   0x7 LB: > { %s483_s18 = sadd.s32 4294967295, %s767_s17   ;;  %s484_s19 = sadd.s32 4294967294, %s767_s17   ;;  %s767_s17 = sphi %s806_s17, %s20_s17   ;;  %s763_s16 = sphi %s804_s16, %s1000_s16   ;;  %s759_s15 = sphi %s802_s15, %s999_s15   ;;  %s755_s14 = sphi %s800_s14, %s998_s14   ;;  %s751_s13 = sphi %s798_s13, %s997_s13   ;;  %s747_s12 = sphi %s796_s12, %s996_s12  }
   0x8   : > { %p61_p0 = scmp.ne.s32.totalorder %s751_s13, %s747_s12  ;;  %p830_p1 = scmp.eq.s32.totalorder %s483_s18, 0 }
   0x9   : > { %p834_p2 = scmp.eq.s32.totalorder %s483_s18, 1  ;;  %p147_p3 = scmp.eq.s32.totalorder %s484_s19, 1 }
   0xa   : > { %p840_p4 = por %p830_p1, %p61_p0  ;;  %p485_p5 = scmp.ge.s32.totalorder %s767_s17, 1 }
   0xb   : > { %p845_p6 = por %p147_p3, %p61_p0  ;;  %p154_p7 = scmp.lt.s32.totalorder %s767_s17, 3 }
   0xc   : > { %s986_s22 = scalar_select %p840_p4, 1, 0 }
   0xd   : > { %s987_s23 = scalar_select %p845_p6, 1, 0 }
   0xe   : > { %p850_p8 = pnand %p485_p5, %p154_p7  ;;  %s769_s25 = smov [#allocation6]  }
   0xf   : > { %s170_s26 = sshll.u32 %s769_s25, 4  ;;  %s39_s28 = sadd.s32 1, %s763_s16  ;;  %s171_s26 = int_to_ptr.vmem [resolvable:$true] %s170_s26 }
  0x10   : > { %p560_p9 = pneg %p850_p8  ;;  %s640_s29 = scalar_lea.vmem %s171_s26, 2048 }
  0x11   : > { %p641_p13 = scmp.ne.s32.totalorder %s171_s26, %s640_s29  ;;  %p648_p5 = scmp.lt.s32.totalorder %s171_s26, %s171_s26 }
  0x12   : > { %p859_p11 = pnand %p560_p9, %p830_p1  ;;  %p649_p7 = scmp.lt.s32.totalorder %s640_s29, %s640_s29 }
  0x14   : > { %p631_p12 = pneg %p859_p11  ;;  %p650_p6 = por %p649_p7, %p648_p5 }
  0x16   : > { %p643_p0 = pnand %p641_p13, %p631_p12 }
  0x18   : > { %p644_p3 = pneg %p643_p0 }
  0x1a   : > { %p651_p4 = pnand %p650_p6, %p644_p3 }
  0x1c   : > { %654 = shalt.err (!%p651_p4)
}
  0x1d   : > { %s770_s30 = smov 128   ;;  %s771_s4 = smov 8  }
  0x1e   : > { %563 = dma.hbm_to_vmem [thread:$0]  (!%p859_p11), %s980_s1, 2048, %s171_s26, [#allocation7], %s770_s30, %s770_s30, %s771_s4  }
  0x1f   : > { %p41_p6 = scmp.ge.s32.totalorder %s39_s28, 2  ;;  %s48_s7 = sadd.s32 1, %s755_s14 }
  0x20   : > { %p55_p4 = scmp.ne.s32.totalorder %s755_s14, %s751_s13  ;;  %p56_p9 = scmp.eq.s32.totalorder %s767_s17, 0 }
  0x21   : > { %s1002_s28 = smov (%p41_p6, %s39_s28), 0  ;;  %p573_p0 = scmp.lt.s32.totalorder %s767_s17, 2 }
  0x22   : > { %p877_p12 = por %p56_p9, %p55_p4  ;;  %p883_p13 = por %p834_p2, %p55_p4 }
  0x23   : > { %s43_s10 = ssub.s32 %s763_s16, %s1002_s28  ;;  %s190_s11 = sand.u32 1, %s755_s14  }
  0x24   : > { %p46_p11 = scmp.eq.s32.totalorder %s43_s10, 0  ;;  %s489_s18 = sshll.u32 %s190_s11, 3 }
  0x25   : > { %s490_s25 = sshll.u32 %s763_s16, 7  ;;  %s194_s30 = scalar_lea.vmem [#allocation3], %s489_s18 }
  0x26   : > { %s892_s19 = scalar_select %p46_p11, %s755_s14, %s48_s7  }
  0x27   : > { %s200_s29 = scalar_lea.hbm %s979_s0, %s490_s25  ;;  %s202_s4 = sshll.u32 %s194_s30, 4  ;;  %s203_s4 = int_to_ptr.vmem [resolvable:$true] %s202_s4 }
  0x28   : > { %p900_p2 = pnand %p573_p0, %p877_p12  ;;  %s191_s5 = scalar_lea.sflag [#allocation4], %s190_s11 }
  0x29   : > { %s668_s6 = scalar_lea.vmem %s203_s4, 128  ;;  %s772_s7 = smov [#allocation3]  }
  0x2a   : > { %p657_p3 = pneg %p900_p2  ;;  %p669_p5 = scmp.ne.s32.totalorder %s203_s4, %s668_s6 }
  0x2b   : > { %s673_s10 = sshll.u32 %s772_s7, 4  ;;  %s674_s10 = int_to_ptr.vmem [resolvable:$false] %s673_s10 }
  0x2c   : > { %p671_p7 = pnand %p669_p5, %p657_p3  ;;  %s675_s25 = scalar_lea.vmem %s674_s10, 256 }
  0x2d   : > { %p676_p4 = scmp.lt.s32.totalorder %s203_s4, %s674_s10  ;;  %p677_p9 = scmp.lt.s32.totalorder %s675_s25, %s668_s6 }
  0x2e   : > { %p672_p6 = pneg %p671_p7 }
  0x2f   : > { %p678_p11 = por %p677_p9, %p676_p4 }
  0x31   : > { %p679_p10 = pnand %p678_p11, %p672_p6 }
  0x33   : > { %682 = shalt.err (!%p679_p10)
}
  0x34   : > { %567 = dma.hbm_to_vmem [thread:$0]  (!%p900_p2), %s200_s29, 128, %s203_s4, %s191_s5  }
  0x35   : > { %211 = sbr.rel (%p850_p8) target bundleno = 302 (0x12e), region = 32  ;;  %s911_s8 = sand.u32 (!%p850_p8), 1, %s751_s13  }
  0x36   : > { %s492_s11 = sshll.u32 (!%p850_p8), %s911_s8, 3  ;;  %s214_s18 = scalar_lea.sflag (!%p850_p8), [#allocation4], %s911_s8 }
  0x37   : > { %s917_s26 = scalar_lea.vmem (!%p850_p8), [#allocation3], %s492_s11  ;;  %p993_p12 = scmp.ne.s32.totalorder (!%p850_p8), %s986_s22, 0 }
  0x3a   : > { %734 = dma.done.wait (%p993_p12), %s214_s18, 128  }
  0x3b   : > { %736 = vsyncadd (%p993_p12), %s214_s18, 4294967168 }
  0x3c   : > { %738 = dma.done.wait (%p830_p1), [#allocation7], 2048  }
  0x3d   : > { %740 = vsyncadd (%p830_p1), [#allocation7], 4294965248  ;;  %v773_v0 = vmov 0.0   ;;  %vm774_vm0 = vmmov 0   ;;  %v273_v1 = vld [vmem:[#allocation6 + $0x78] sm:$0xff]  ;;  %v272_v2 = vld [vmem:[#allocation6 + $0x70] sm:$0xff] }
  0x3e   : > { %517 = vmatprep.subr.mxu0 %v773_v0  ;;  %549 = vmatprep.mubr.msk.f32.mxu0 %vm774_vm0, %v773_v0  ;;  %v271_v3 = vld [vmem:[#allocation6 + $0x68] sm:$0xff]  ;;  %v270_v4 = vld [vmem:[#allocation6 + $0x60] sm:$0xff]  ;;  %v269_v5 = vld [vmem:[#allocation6 + $0x58] sm:$0xff]  ;;  %s497_s24 = sshll.u32 %s759_s15, 7  ;;  %s246_s27 = scalar_lea.vmem [#allocation8], %s492_s11 }
  0x3f   : > { %518 = vmatpush3.msra.mxu0 %v273_v1  ;;  %v268_v6 = vld [vmem:[#allocation6 + $0x50] sm:$0xff]  ;;  %v267_v7 = vld [vmem:[#allocation6 + $0x48] sm:$0xff]  ;;  %v266_v8 = vld [vmem:[#allocation6 + $0x40] sm:$0xff]  ;;  %s374_s29 = sshll.u32 %s246_s27, 4  ;;  %s937_s21 = scalar_lea.hbm %s982_s3, %s497_s24  ;;  %s375_s29 = int_to_ptr.vmem [resolvable:$true] %s374_s29 }
  0x40   : > { %519 = vmatprep.subr.mxu0 %v773_v0  ;;  %v265_v9 = vld [vmem:[#allocation6 + $0x38] sm:$0xff]  ;;  %v264_v10 = vld [vmem:[#allocation6 + $0x30] sm:$0xff]  ;;  %v263_v11 = vld [vmem:[#allocation6 + $0x28] sm:$0xff]  ;;  %s360_s5 = scalar_lea.sflag [#allocation5], %s911_s8  ;;  %s683_s6 = scalar_lea.vmem %s375_s29, 128 }
  0x41   : > { %520 = vmatpush3.msra.mxu0 %v272_v2  ;;  %v262_v12 = vld [vmem:[#allocation6 + $0x20] sm:$0xff]  ;;  %v261_v13 = vld [vmem:[#allocation6 + $0x18] sm:$0xff]  ;;  %v260_v14 = vld [vmem:[#allocation6 + $0x10] sm:$0xff]  ;;  %p684_p1 = scmp.ne.s32.totalorder %s375_s29, %s683_s6  ;;  %s775_s15 = smov [#allocation8]  }
  0x42   : > { %521 = vmatprep.subr.mxu0 %v773_v0  ;;  %v259_v15 = vld [vmem:[#allocation6 + $0x8] sm:$0xff]  ;;  %v258_v16 = vld [vmem:[#allocation6] sm:$0xff]  ;;  %v257_v17 = vld [vmem:[%s917_s26] sm:$0xff]  ;;  %s687_s7 = sshll.u32 %s775_s15, 4  ;;  %s688_s7 = int_to_ptr.vmem [resolvable:$false] %s687_s7 }
  0x43   : > { %522 = vmatpush3.msra.mxu0 %v271_v3  ;;  %v495_v18 = vld [vmem:[%s981_s2] ss:$0 sm:$0xff]  ;;  %p685_p8 = pnand %p684_p1, %p883_p13  ;;  %s689_s10 = scalar_lea.vmem %s688_s7, 256 }
  0x44   : > { %523 = vmatprep.subr.mxu0 %v773_v0  ;;  %p690_p0 = scmp.lt.s32.totalorder %s375_s29, %s688_s7  ;;  %p691_p2 = scmp.lt.s32.totalorder %s689_s10, %s683_s6 }
  0x45   : > { %524 = vmatpush3.msra.mxu0 %v270_v4  ;;  %p686_p10 = pneg %p685_p8 }
  0x46   : > { %525 = vmatprep.subr.mxu0 %v773_v0  ;;  %p692_p3 = por %p691_p2, %p690_p0 }
  0x47   : > { %526 = vmatpush3.msra.mxu0 %v269_v5 }
  0x48   : > { %527 = vmatprep.subr.mxu0 %v773_v0  ;;  %p693_p5 = pnand %p692_p3, %p686_p10 }
  0x49   : > { %528 = vmatpush3.msra.mxu0 %v268_v6 }
  0x4a   : > { %529 = vmatprep.subr.mxu0 %v773_v0 }
  0x4b   : > { %530 = vmatpush3.msra.mxu0 %v267_v7 }
  0x4c   : > { %531 = vmatprep.subr.mxu0 %v773_v0 }
  0x4d   : > { %532 = vmatpush3.msra.mxu0 %v266_v8 }
  0x4e   : > { %533 = vmatprep.subr.mxu0 %v773_v0 }
  0x4f   : > { %534 = vmatpush3.msra.mxu0 %v265_v9 }
  0x50   : > { %535 = vmatprep.subr.mxu0 %v773_v0 }
  0x51   : > { %536 = vmatpush3.msra.mxu0 %v264_v10 }
  0x52   : > { %537 = vmatprep.subr.mxu0 %v773_v0 }
  0x53   : > { %538 = vmatpush3.msra.mxu0 %v263_v11 }
  0x54   : > { %539 = vmatprep.subr.mxu0 %v773_v0 }
  0x55   : > { %540 = vmatpush3.msra.mxu0 %v262_v12 }
  0x56   : > { %541 = vmatprep.subr.mxu0 %v773_v0 }
  0x57   : > { %542 = vmatpush3.msra.mxu0 %v261_v13 }
  0x58   : > { %543 = vmatprep.subr.mxu0 %v773_v0 }
  0x59   : > { %544 = vmatpush3.msra.mxu0 %v260_v14 }
  0x5a   : > { %545 = vmatprep.subr.mxu0 %v773_v0 }
  0x5b   : > { %546 = vmatpush3.msra.mxu0 %v259_v15 }
  0x5c   : > { %547 = vmatprep.subr.mxu0 %v773_v0 }
  0x5d   : > { %548 = vmatpush3.msra.mxu0 %v258_v16 }
  0x5e   : > { %550 = vmatmul.mubr.f32.vlgmr.msra.gmra.mxu0 %v257_v17 }
 0x11e   : > { %v340_v19 = vpop.f32.mrf.mxu0 }
 0x11f   : > { %v357_v20 = vadd.f32 %v495_v18, %v340_v19 }
 0x120   : > { %v551_v21 = vpop.f32.mrf.mxu0 }
 0x121   : > { %358 = vst [vmem:[%s246_s27] sm:$0xff] %v357_v20 }
 0x122   : > { %696 = shalt.err (!%p693_p5)
}
 0x123   : > { %s697_s25 = scalar_lea.hbm %s937_s21, 128  ;;  %s701_s18 = scalar_lea.hbm %s982_s3, 256 }
 0x124   : > { %p698_p7 = scmp.ne.s32.totalorder %s937_s21, %s697_s25  ;;  %p702_p9 = scmp.lt.s32.totalorder %s937_s21, %s982_s3 }
 0x125   : > { %p703_p11 = scmp.lt.s32.totalorder %s701_s18, %s697_s25 }
 0x126   : > { %p699_p6 = pnand %p698_p7, %p883_p13 }
 0x127   : > { %p704_p12 = por %p703_p11, %p702_p9 }
 0x128   : > { %p700_p4 = pneg %p699_p6 }
 0x12a   : > { %p705_p1 = pnand %p704_p12, %p700_p4 }
 0x12c   : > { %708 = shalt.err (!%p705_p1)
}
 0x12d   : > { %558 = dma.vmem_to_hbm [thread:$0]  (%p883_p13), %s375_s29, 128, %s937_s21, %s360_s5  }
 0x12e PF: > { %s386_s22 = sand.u32 1, %s747_s12   ;;  %p994_p8 = scmp.ne.s32.totalorder %s987_s23, 0 }
 0x12f   : > { %p995_p10 = scmp.ge.s32.totalorder %s767_s17, 2  ;;  %s387_s24 = scalar_lea.sflag [#allocation5], %s386_s22 }
 0x131   : > { %p569_p0 = pnand %p995_p10, %p994_p8 }
 0x133   : > { %p570_p2 = pneg %p569_p0 }
 0x135   : > { %742 = dma.done.wait (%p570_p2), %s387_s24, 128  }
 0x136   : > { %744 = vsyncadd (%p570_p2), %s387_s24, 4294967168  ;;  %s20_s17 = sadd.s32 1, %s767_s17   ;;  %s996_s12 = smov %s751_s13 }
 0x137   : > { %p17_p3 = scmp.ge.s32.totalorder %s20_s17, 4   ;;  %s997_s13 = smov %s755_s14 }
 0x138   : > { %s998_s14 = smov %s892_s19  ;;  %s999_s15 = smov %s763_s16 }
 0x139   : > { %s1000_s16 = smov %s1002_s28  ;;  %19 = sbr.rel (!%p17_p3) target bundleno = 7 (0x7), region = 93 }
 0x13e   :  { %392 = vsyncpa [#allocation4], 1 }
 0x13f   :  { %394 = vsyncpa [#allocation4 + $0x1], 1 }
 0x140   :  { %395 = vsyncpa [#allocation7], 1 }
 0x141   :  { %396 = vsyncpa [#allocation5], 1 }
 0x142   :  { %398 = vsyncpa [#allocation5 + $0x1], 1 }

</bundles_post_ra>
